<compile_context>
chip_gen: v7x
topology: tpu7x:2x2x1
jax: 0.10.0
libtpu: 0.0.40
codegen_flags: <defaults>
</compile_context>

<pallas_src>
import functools

import jax
import jax.numpy as jnp
from jax.experimental import pallas as pl
from jax.experimental.pallas import tpu as pltpu

NUM_CLASSES = 7
LATENT_DIM = 256
OTHER_DIM = 128
BN_EPS = 1e-5
K_PAD = 8  # num_classes padded to a sublane-friendly size


def _round_up(x, m):
    return ((x + m - 1) // m) * m


def _bn_stats_kernel(y_ref, w1_ref, b1_ref, gamma_ref, beta_ref,
                     scale_ref, shift_ref, sum_acc, sq_acc,
                     *, batch, tile_b):
    """Pass 1: accumulate global BN statistics, emit folded scale/shift."""
    t = pl.program_id(0)

    @pl.when(t == 0)
    def _():
        sum_acc[...] = jnp.zeros_like(sum_acc)
        sq_acc[...] = jnp.zeros_like(sq_acc)

    # Linear(num_classes -> other_dim) + ReLU  (K padded to 8 in the wrapper)
    h = jnp.dot(y_ref[...], w1_ref[...],
                preferred_element_type=jnp.float32) + b1_ref[...]
    h = jnp.maximum(h, 0.0)

    # Ragged cdiv grid: rows of the last block past `batch` hold unspecified
    # data — mask them so they do not pollute the global statistics.
    row = t * tile_b + jax.lax.broadcasted_iota(jnp.int32, h.shape, 0)
    h = jnp.where(row < batch, h, 0.0)

    sum_acc[...] += jnp.sum(h, axis=0, keepdims=True)
    sq_acc[...] += jnp.sum(h * h, axis=0, keepdims=True)

    @pl.when(t == pl.num_programs(0) - 1)
    def _():
        inv_n = 1.0 / float(batch)
        mean = sum_acc[...] * inv_n
        # E[x^2] - E[x]^2 in f32: post-ReLU activations of a small linear layer
        # are O(1), so cancellation is well within the checked tolerance.
        var = sq_acc[...] * inv_n - mean * mean        # biased variance
        scale = jax.lax.rsqrt(var + BN_EPS) * gamma_ref[...]
        scale_ref[...] = scale
        shift_ref[...] = beta_ref[...] - mean * scale


def _apply_kernel(y_ref, w1_ref, b1_ref, wml_ref, bml_ref, eps_ref,
                  z_ref, mu_ref, lv_ref):
    """Pass 2: first linear + fused (BN-folded) mu/logvar matmul + reparam."""
    h = jnp.dot(y_ref[...], w1_ref[...],
                preferred_element_type=jnp.float32) + b1_ref[...]
    h = jnp.maximum(h, 0.0)

    # BatchNorm scale/shift are pre-folded into wml/bml by the wrapper, so the
    # normalize step costs zero extra ops here.  One fused lane-dense
    # (tile_b, 128) @ (128, 512) matmul produces [mu | logvar].
    out = jnp.dot(h, wml_ref[...],
                  preferred_element_type=jnp.float32) + bml_ref[...]
    mu = out[:, :LATENT_DIM]
    lv = out[:, LATENT_DIM:]

    z_ref[...] = mu + eps_ref[...] * jnp.exp(0.5 * lv)
    mu_ref[...] = mu
    lv_ref[...] = lv


def generator_forward(y, params, eps, *, tile_b=None, tile_stats=None):
    B = y.shape[0]

    # Pass-2 tile: at least 2 tiles (v7x megacore sharding) whenever B > 8,
    # capped at 1024 rows (~8 MiB double-buffered residency, safe everywhere).
    if tile_b is None:
        tile_b = min(1024, max(8, _round_up(-(-B // 2), 8)))
    tile_b = max(8, (tile_b // 8) * 8)
    n_tiles = pl.cdiv(B, tile_b)

    # Pass-1 tile: much larger — the stats pass only reads ~32 B/row of HBM, so
    # per-grid-step overhead dominates at small tiles.
    if tile_stats is None:
        tile_stats = min(4096, max(8, (B // 8) * 8))
    tile_stats = max(8, (tile_stats // 8) * 8)
    n_stats = pl.cdiv(B, tile_stats)

    # Only wrapper-side data copy: pad num_classes 7 -> 8 (32 B/row).
    y_p = jnp.pad(y.astype(jnp.float32), ((0, 0), (0, K_PAD - NUM_CLASSES)))
    eps = eps.astype(jnp.float32)

    w1_p = jnp.zeros((K_PAD, OTHER_DIM), jnp.float32).at[:NUM_CLASSES].set(
        params["w1"].astype(jnp.float32))
    b1 = params["b1"].reshape(1, OTHER_DIM).astype(jnp.float32)
    gamma = params["gamma"].reshape(1, OTHER_DIM).astype(jnp.float32)
    beta = params["beta"].reshape(1, OTHER_DIM).astype(jnp.float32)

    # Fuse the mu / logvar projections into one lane-dense (128, 512) weight.
    w_ml = jnp.concatenate(
        [params["w_mu"], params["w_lv"]], axis=1).astype(jnp.float32)
    b_ml = jnp.concatenate(
        [params["b_mu"].reshape(1, -1), params["b_lv"].reshape(1, -1)],
        axis=1).astype(jnp.float32)

    vmem_limit = 32 * 1024 * 1024  # explicit: safe on v5e / v6e / v7x
    w1_spec = pl.BlockSpec((K_PAD, OTHER_DIM), lambda t: (0, 0))
    vec_spec = pl.BlockSpec((1, OTHER_DIM), lambda t: (0, 0))

    # ---- pass 1: global BatchNorm statistics -> folded scale / shift ----
    scale, shift = pl.pallas_call(
        functools.partial(_bn_stats_kernel, batch=B, tile_b=tile_stats),
        out_shape=(
            jax.ShapeDtypeStruct((1, OTHER_DIM), jnp.float32),
            jax.ShapeDtypeStruct((1, OTHER_DIM), jnp.float32),
        ),
        grid=(n_stats,),
        in_specs=[
            pl.BlockSpec((tile_stats, K_PAD), lambda t: (t, 0)),
            w1_spec, vec_spec, vec_spec, vec_spec,
        ],
        out_specs=(vec_spec, vec_spec),
        scratch_shapes=[
            pltpu.VMEM((1, OTHER_DIM), jnp.float32),   # sum accumulator
            pltpu.VMEM((1, OTHER_DIM), jnp.float32),   # sum-of-squares acc
        ],
        compiler_params=pltpu.CompilerParams(
            dimension_semantics=("arbitrary",),
            vmem_limit_bytes=vmem_limit,
        ),
    )(y_p, w1_p, b1, gamma, beta)

    # Fold BatchNorm affine into the fused mu|logvar projection (tiny one-time
    # XLA ops between the passes):  (h*s + t) @ W + b == h @ (sᵀ*W) + (t@W + b).
    w_ml_f = w_ml * scale.reshape(OTHER_DIM, 1)
    b_ml_f = shift @ w_ml + b_ml

    # ---- pass 2: first linear + fused matmul + reparameterize ----
    lat_spec = pl.BlockSpec((tile_b, LATENT_DIM), lambda t: (t, 0))
    z, mu, lv = pl.pallas_call(
        _apply_kernel,
        out_shape=(
            jax.ShapeDtypeStruct((B, LATENT_DIM), jnp.float32),  # z
            jax.ShapeDtypeStruct((B, LATENT_DIM), jnp.float32),  # mu
            jax.ShapeDtypeStruct((B, LATENT_DIM), jnp.float32),  # logvar
        ),
        grid=(n_tiles,),
        in_specs=[
            pl.BlockSpec((tile_b, K_PAD), lambda t: (t, 0)),          # y
            w1_spec,                                                  # w1
            vec_spec,                                                 # b1
            pl.BlockSpec((OTHER_DIM, 2 * LATENT_DIM), lambda t: (0, 0)),  # w_ml'
            pl.BlockSpec((1, 2 * LATENT_DIM), lambda t: (0, 0)),          # b_ml'
            lat_spec,                                                 # eps
        ],
        out_specs=(lat_spec, lat_spec, lat_spec),
        compiler_params=pltpu.CompilerParams(
            dimension_semantics=("parallel",),   # megacore sharding on v7x
            vmem_limit_bytes=vmem_limit,
        ),
    )(y_p, w1_p, b1, w_ml_f, b_ml_f, eps)

    return z, mu, lv


def init_params(key):
    """Deterministic init mimicking PyTorch defaults (U(-1/sqrt(fan_in), +))."""
    ks = jax.random.split(key, 6)

    def lin_init(kw, kb, fan_in, fan_out):
        bound = 1.0 / jnp.sqrt(jnp.float32(fan_in))
        w = jax.random.uniform(kw, (fan_in, fan_out), jnp.float32, -bound, bound)
        b = jax.random.uniform(kb, (1, fan_out), jnp.float32, -bound, bound)
        return w, b

    w1, b1 = lin_init(ks[0], ks[1], NUM_CLASSES, OTHER_DIM)
    w_mu, b_mu = lin_init(ks[2], ks[3], OTHER_DIM, LATENT_DIM)
    w_lv, b_lv = lin_init(ks[4], ks[5], OTHER_DIM, LATENT_DIM)
    gamma = jnp.ones((1, OTHER_DIM), jnp.float32)   # BatchNorm1d weight
    beta = jnp.zeros((1, OTHER_DIM), jnp.float32)   # BatchNorm1d bias
    return {
        "w1": w1, "b1": b1, "gamma": gamma, "beta": beta,
        "w_mu": w_mu, "b_mu": b_mu, "w_lv": w_lv, "b_lv": b_lv,
    }


def reference_forward(y, params, eps):
    """Pure-JAX reference for correctness check."""
    h = y @ params["w1"] + params["b1"]
    h = jnp.maximum(h, 0.0)
    mean = jnp.mean(h, axis=0, keepdims=True)
    var = jnp.mean((h - mean) ** 2, axis=0, keepdims=True)
    h = (h - mean) / jnp.sqrt(var + BN_EPS) * params["gamma"] + params["beta"]
    mu = h @ params["w_mu"] + params["b_mu"]
    lv = h @ params["w_lv"] + params["b_lv"]
    z = mu + eps * jnp.exp(0.5 * lv)
    return z, mu, lv


if __name__ == "__main__":
    key = jax.random.PRNGKey(0)
    k_param, k_y, k_eps = jax.random.split(key, 3)

    # Small batch, deliberately NOT a multiple of 8 or of the tile so the
    # ragged-grid / partial-last-block and multi-tile accumulation paths are
    # all exercised (default tiles: pass1 tile=16, pass2 tile=16 -> 2 tiles).
    B = 20
    params = init_params(k_param)
    y = jax.nn.one_hot(
        jax.random.randint(k_y, (B,), 0, NUM_CLASSES), NUM_CLASSES
    ).astype(jnp.float32)
    eps = jax.random.normal(k_eps, (B, LATENT_DIM), jnp.float32)

    z, mu, logvar = generator_forward(y, params, eps)
    jax.block_until_ready((z, mu, logvar))

    # sanity check against pure-JAX reference
    z_ref, mu_ref, lv_ref = reference_forward(y, params, eps)
    assert z.shape == (B, LATENT_DIM) and mu.shape == (B, LATENT_DIM)
    assert jnp.allclose(z, z_ref, atol=2e-4, rtol=2e-4)
    assert jnp.allclose(mu, mu_ref, atol=2e-4, rtol=2e-4)
    assert jnp.allclose(logvar, lv_ref, atol=2e-4, rtol=2e-4)

    print("KERNEL_OK")
</pallas_src>

<mosaic_0001>
module attributes {stable_mosaic.version = 11 : i64} {
  func.func @_bn_stats_kernel(%arg0: i32, %arg1: memref<16x8xf32, #tpu.memory_space<vmem>>, %arg2: memref<8x128xf32, #tpu.memory_space<vmem>>, %arg3: memref<1x128xf32, #tpu.memory_space<vmem>>, %arg4: memref<1x128xf32, #tpu.memory_space<vmem>>, %arg5: memref<1x128xf32, #tpu.memory_space<vmem>>, %arg6: memref<1x128xf32, #tpu.memory_space<vmem>>, %arg7: memref<1x128xf32, #tpu.memory_space<vmem>>, %arg8: memref<1x128xf32, #tpu.memory_space<vmem>>, %arg9: memref<1x128xf32, #tpu.memory_space<vmem>>) attributes {dimension_semantics = [#tpu.dimension_semantics<arbitrary>], iteration_bounds = array<i64: 2>, scalar_prefetch = 0 : i64, scratch_operands = 2 : i64, tpu.core_type = #tpu.core_type<tc>, window_params = [{transform_indices = @transform_0, window_bounds = array<i64: 16, 8>}, {pipeline_mode = #tpu.pipeline_mode<synchronous>, transform_indices = @transform_1, window_bounds = array<i64: 8, 128>}, {pipeline_mode = #tpu.pipeline_mode<synchronous>, transform_indices = @transform_2, window_bounds = array<i64: 1, 128>}, {pipeline_mode = #tpu.pipeline_mode<synchronous>, transform_indices = @transform_3, window_bounds = array<i64: 1, 128>}, {pipeline_mode = #tpu.pipeline_mode<synchronous>, transform_indices = @transform_4, window_bounds = array<i64: 1, 128>}, {pipeline_mode = #tpu.pipeline_mode<synchronous>, transform_indices = @transform_5, window_bounds = array<i64: 1, 128>}, {pipeline_mode = #tpu.pipeline_mode<synchronous>, transform_indices = @transform_6, window_bounds = array<i64: 1, 128>}]} {
    %c0_i32 = arith.constant 0 : i32
    %0 = arith.cmpi eq, %arg0, %c0_i32 : i32
    %1 = arith.extui %0 : i1 to i32
    %c0_i32_0 = arith.constant 0 : i32
    %2 = arith.cmpi ne, %1, %c0_i32_0 : i32
    scf.if %2 {
      %cst_19 = arith.constant 0.000000e+00 : f32
      %33 = vector.broadcast %cst_19 : f32 to vector<1x128xf32>
      %c0_20 = arith.constant 0 : index
      %c0_21 = arith.constant 0 : index
      %34 = vector.load %arg8[%c0_20, %c0_21] : memref<1x128xf32, #tpu.memory_space<vmem>>, vector<1x128xf32>
      tpu.vector_store %arg8[%c0_20, %c0_21], %33 {strides = array<i32>} : memref<1x128xf32, #tpu.memory_space<vmem>>, vector<1x128xf32>,
      %cst_22 = arith.constant 0.000000e+00 : f32
      %35 = vector.broadcast %cst_22 : f32 to vector<1x128xf32>
      %c0_23 = arith.constant 0 : index
      %c0_24 = arith.constant 0 : index
      %36 = vector.load %arg9[%c0_23, %c0_24] : memref<1x128xf32, #tpu.memory_space<vmem>>, vector<1x128xf32>
      tpu.vector_store %arg9[%c0_23, %c0_24], %35 {strides = array<i32>} : memref<1x128xf32, #tpu.memory_space<vmem>>, vector<1x128xf32>,
    } else {
    }
    %c0 = arith.constant 0 : index
    %c0_1 = arith.constant 0 : index
    %3 = vector.load %arg1[%c0, %c0_1] : memref<16x8xf32, #tpu.memory_space<vmem>>, vector<16x8xf32>
    %c0_2 = arith.constant 0 : index
    %c0_3 = arith.constant 0 : index
    %4 = vector.load %arg2[%c0_2, %c0_3] : memref<8x128xf32, #tpu.memory_space<vmem>>, vector<8x128xf32>
    %cst = arith.constant dense<0.000000e+00> : vector<16x128xf32>
    %5 = tpu.matmul %3, %4, %cst {dimension_numbers = #tpu.dot_dimension_numbers<[1], [0], [0], [1], [0, 0, 1, 1], [], []>} : vector<16x8xf32>, vector<8x128xf32>, vector<16x128xf32> -> vector<16x128xf32>
    %c0_4 = arith.constant 0 : index
    %c0_5 = arith.constant 0 : index
    %6 = vector.load %arg3[%c0_4, %c0_5] : memref<1x128xf32, #tpu.memory_space<vmem>>, vector<1x128xf32>
    %7 = vector.broadcast %6 : vector<1x128xf32> to vector<16x128xf32>
    %8 = arith.addf %5, %7 : vector<16x128xf32>
    %cst_6 = arith.constant 0.000000e+00 : f32
    %9 = vector.broadcast %cst_6 : f32 to vector<16x128xf32>
    %10 = arith.maximumf %8, %9 : vector<16x128xf32>
    %c16_i32 = arith.constant 16 : i32
    %11 = arith.muli %arg0, %c16_i32 : i32
    %12 = tpu.iota {dimensions = array<i32: 0>} : vector<16x128xi32>
    %13 = vector.broadcast %11 : i32 to vector<16x128xi32>
    %14 = arith.addi %13, %12 : vector<16x128xi32>
    %c20_i32 = arith.constant 20 : i32
    %15 = vector.broadcast %c20_i32 : i32 to vector<16x128xi32>
    %16 = arith.cmpi slt, %14, %15 : vector<16x128xi32>
    %cst_7 = arith.constant 0.000000e+00 : f32
    %17 = vector.broadcast %cst_7 : f32 to vector<16x128xf32>
    %18 = arith.select %16, %10, %17 : vector<16x128xi1>, vector<16x128xf32>
    %c0_8 = arith.constant 0 : index
    %c0_9 = arith.constant 0 : index
    %19 = vector.load %arg8[%c0_8, %c0_9] : memref<1x128xf32, #tpu.memory_space<vmem>>, vector<1x128xf32>
    %cst_10 = arith.constant dense<0.000000e+00> : vector<128xf32>
    %20 = vector.multi_reduction <add>, %18, %cst_10 [0] : vector<16x128xf32> to vector<128xf32>
    %21 = vector.shape_cast %20 : vector<128xf32> to vector<1x128xf32>
    %22 = arith.addf %19, %21 : vector<1x128xf32>
    %c0_11 = arith.constant 0 : index
    %c0_12 = arith.constant 0 : index
    %23 = vector.load %arg8[%c0_11, %c0_12] : memref<1x128xf32, #tpu.memory_space<vmem>>, vector<1x128xf32>
    tpu.vector_store %arg8[%c0_11, %c0_12], %22 {strides = array<i32>} : memref<1x128xf32, #tpu.memory_space<vmem>>, vector<1x128xf32>,
    %c0_13 = arith.constant 0 : index
    %c0_14 = arith.constant 0 : index
    %24 = vector.load %arg9[%c0_13, %c0_14] : memref<1x128xf32, #tpu.memory_space<vmem>>, vector<1x128xf32>
    %25 = arith.mulf %18, %18 : vector<16x128xf32>
    %cst_15 = arith.constant dense<0.000000e+00> : vector<128xf32>
    %26 = vector.multi_reduction <add>, %25, %cst_15 [0] : vector<16x128xf32> to vector<128xf32>
    %27 = vector.shape_cast %26 : vector<128xf32> to vector<1x128xf32>
    %28 = arith.addf %24, %27 : vector<1x128xf32>
    %c0_16 = arith.constant 0 : index
    %c0_17 = arith.constant 0 : index
    %29 = vector.load %arg9[%c0_16, %c0_17] : memref<1x128xf32, #tpu.memory_space<vmem>>, vector<1x128xf32>
    tpu.vector_store %arg9[%c0_16, %c0_17], %28 {strides = array<i32>} : memref<1x128xf32, #tpu.memory_space<vmem>>, vector<1x128xf32>,
    %c1_i32 = arith.constant 1 : i32
    %30 = arith.cmpi eq, %arg0, %c1_i32 : i32
    %31 = arith.extui %30 : i1 to i32
    %c0_i32_18 = arith.constant 0 : i32
    %32 = arith.cmpi ne, %31, %c0_i32_18 : i32
    scf.if %32 {
      %c0_19 = arith.constant 0 : index
      %c0_20 = arith.constant 0 : index
      %33 = vector.load %arg8[%c0_19, %c0_20] : memref<1x128xf32, #tpu.memory_space<vmem>>, vector<1x128xf32>
      %cst_21 = arith.constant 5.000000e-02 : f32
      %34 = vector.broadcast %cst_21 : f32 to vector<1x128xf32>
      %35 = arith.mulf %33, %34 : vector<1x128xf32>
      %c0_22 = arith.constant 0 : index
      %c0_23 = arith.constant 0 : index
      %36 = vector.load %arg9[%c0_22, %c0_23] : memref<1x128xf32, #tpu.memory_space<vmem>>, vector<1x128xf32>
      %cst_24 = arith.constant 5.000000e-02 : f32
      %37 = vector.broadcast %cst_24 : f32 to vector<1x128xf32>
      %38 = arith.mulf %36, %37 : vector<1x128xf32>
      %39 = arith.mulf %35, %35 : vector<1x128xf32>
      %40 = arith.subf %38, %39 : vector<1x128xf32>
      %cst_25 = arith.constant 9.99999974E-6 : f32
      %41 = vector.broadcast %cst_25 : f32 to vector<1x128xf32>
      %42 = arith.addf %40, %41 : vector<1x128xf32>
      %43 = math.rsqrt %42 : vector<1x128xf32>
      %c0_26 = arith.constant 0 : index
      %c0_27 = arith.constant 0 : index
      %44 = vector.load %arg4[%c0_26, %c0_27] : memref<1x128xf32, #tpu.memory_space<vmem>>, vector<1x128xf32>
      %45 = arith.mulf %43, %44 : vector<1x128xf32>
      %c0_28 = arith.constant 0 : index
      %c0_29 = arith.constant 0 : index
      %46 = vector.load %arg6[%c0_28, %c0_29] : memref<1x128xf32, #tpu.memory_space<vmem>>, vector<1x128xf32>
      tpu.vector_store %arg6[%c0_28, %c0_29], %45 {strides = array<i32>} : memref<1x128xf32, #tpu.memory_space<vmem>>, vector<1x128xf32>,
      %c0_30 = arith.constant 0 : index
      %c0_31 = arith.constant 0 : index
      %47 = vector.load %arg5[%c0_30, %c0_31] : memref<1x128xf32, #tpu.memory_space<vmem>>, vector<1x128xf32>
      %48 = arith.mulf %35, %45 : vector<1x128xf32>
      %49 = arith.subf %47, %48 : vector<1x128xf32>
      %c0_32 = arith.constant 0 : index
      %c0_33 = arith.constant 0 : index
      %50 = vector.load %arg7[%c0_32, %c0_33] : memref<1x128xf32, #tpu.memory_space<vmem>>, vector<1x128xf32>
      tpu.vector_store %arg7[%c0_32, %c0_33], %49 {strides = array<i32>} : memref<1x128xf32, #tpu.memory_space<vmem>>, vector<1x128xf32>,
    } else {
    }
    return
  }
  func.func @transform_0(%arg0: i32) -> (i32, i32) {
    %c0_i32 = arith.constant 0 : i32
    %c0_i32_0 = arith.constant 0 : i32
    return %arg0, %c0_i32 : i32, i32
  }
  func.func @transform_1(%arg0: i32) -> (i32, i32) {
    %c0_i32 = arith.constant 0 : i32
    %c0_i32_0 = arith.constant 0 : i32
    %c0_i32_1 = arith.constant 0 : i32
    return %c0_i32, %c0_i32_0 : i32, i32
  }
  func.func @transform_2(%arg0: i32) -> (i32, i32) {
    %c0_i32 = arith.constant 0 : i32
    %c0_i32_0 = arith.constant 0 : i32
    %c0_i32_1 = arith.constant 0 : i32
    return %c0_i32, %c0_i32_0 : i32, i32
  }
  func.func @transform_3(%arg0: i32) -> (i32, i32) {
    %c0_i32 = arith.constant 0 : i32
    %c0_i32_0 = arith.constant 0 : i32
    %c0_i32_1 = arith.constant 0 : i32
    return %c0_i32, %c0_i32_0 : i32, i32
  }
  func.func @transform_4(%arg0: i32) -> (i32, i32) {
    %c0_i32 = arith.constant 0 : i32
    %c0_i32_0 = arith.constant 0 : i32
    %c0_i32_1 = arith.constant 0 : i32
    return %c0_i32, %c0_i32_0 : i32, i32
  }
  func.func @transform_5(%arg0: i32) -> (i32, i32) {
    %c0_i32 = arith.constant 0 : i32
    %c0_i32_0 = arith.constant 0 : i32
    %c0_i32_1 = arith.constant 0 : i32
    return %c0_i32, %c0_i32_0 : i32, i32
  }
  func.func @transform_6(%arg0: i32) -> (i32, i32) {
    %c0_i32 = arith.constant 0 : i32
    %c0_i32_0 = arith.constant 0 : i32
    %c0_i32_1 = arith.constant 0 : i32
    return %c0_i32, %c0_i32_0 : i32, i32
  }
}

</mosaic_0001>

<bundles_post_ra>
// kernel: tpu_custom_call.1
= control target key start
LH: loop header
LB: loop body
LE: loop exit
PB: predicated region body
PF: predicated region fallthrough
CT: control target
= control target key end

     0   :  { %12 = vsyncpa [#allocation5], 0  ;;  %s713_s0 = inlined_call_operand.vmem [shape: f32[20,8], index: 0, kind: input, shape index: {}]   ;;  %s714_s1 = inlined_call_operand.vmem [shape: f32[8,128], index: 1, kind: input, shape index: {}]   ;;  %s715_s2 = inlined_call_operand.vmem [shape: f32[1,128], index: 2, kind: input, shape index: {}]   ;;  %s716_s3 = inlined_call_operand.vmem [shape: f32[1,128], index: 3, kind: input, shape index: {}]   ;;  %s717_s4 = inlined_call_operand.vmem [shape: f32[1,128], index: 4, kind: input, shape index: {}]   ;;  %s718_s5 = inlined_call_operand.hbm [shape: f32[1,128], index: 5, kind: output, shape index: {0}]   ;;  %s719_s6 = inlined_call_operand.hbm [shape: f32[1,128], index: 6, kind: output, shape index: {1}]  }
   0x1   :  { %13 = vsyncpa [#allocation7], 0  ;;  %s636_s21 = smov 0  }
   0x2 LB: > { %s642_s22 = sadd.s32 4294967295, %s596_s21   ;;  %p482_p0 = scmp.ge.s32.totalorder %s596_s21, 1  ;;  %s596_s21 = sphi %s636_s21, %s19_s21  }
   0x3   : > { %p216_p1 = scmp.lt.s32.totalorder %s596_s21, 3 }
   0x5   : > { %p217_p2 = pnand %p482_p0, %p216_p1 }
   0x6   : > { %s483_s23 = sshll.u32 (!%p217_p2), %s642_s22, 1  ;;  %p485_p4 = scmp.ne.s32.totalorder (!%p217_p2), %s642_s22, 0 }
   0x7   : > { %220 = sbr.rel (%p217_p2) target bundleno = 340 (0x154), region = 40  ;;  %p250_p3 = scmp.lt.s32.totalorder (!%p217_p2), %s483_s23, 2 }
   0xe   : > { %s721_s23 = smov (!%p250_p3, %s483_s23), 2  ;;  %262 = sbr.rel (%p485_p4) target bundleno = 21 (0x15), region = 44 }
   0xf   : > { %s484_s24 = sshll.u32 %s721_s23, 3  ;;  %v598_v0 = vmov (!%p485_p4), 0.0  }
  0x10   : > { %s253_s27 = scalar_lea.vmem %s713_s0, %s484_s24  ;;  %263 = vst [vmem:[#allocation2] sm:$0x1] (!%p485_p4), %v598_v0  ;;  %264 = vst [vmem:[#allocation3] sm:$0x1] (!%p485_p4), %v598_v0 }
  0x15 PF: > { %v267_v1 = vld [vmem:[%s714_s1] sm:$0xff]  ;;  %vm275_vm0 = vcmask 64512   ;;  %v266_v3 = vld [vmem:[%s253_s27 + $0x8] sm:$0xff]  ;;  %v360_v4 = vlaneseq  ;;  %s489_s30 = sshll.u32 %s642_s22, 4  ;;  %p490_p5 = scmp.ne.s32.totalorder %s642_s22, 1 }
  0x16   : > { %v265_v2 = vld [vmem:[%s253_s27] sm:$0xff]  ;;  %500 = vmatprep.subr.mxu0 %v267_v1  ;;  %v363_v7 = vstv %s489_s30 }
  0x17   : > { %502 = vmatprep.mubr.msk.f32.mxu0 %vm275_vm0, %v265_v2  ;;  %501 = vmatpush3.msra.mxu0 %v267_v1  ;;  %v361_v5 = vshrl.u32 %v360_v4, 7  ;;  %v486_v8 = vld [vmem:[%s715_s2] ss:$0 sm:$0xff]  ;;  %v380_v35 = vld [vmem:[#allocation3] sm:$0x1] }
  0x18   : > { %503 = vmatmul.mubr.msk.f32.vlgmr.msra.gmra.mrb[0].mxu0 %vm275_vm0, %v266_v3  ;;  %v370_v32 = vld [vmem:[#allocation2] sm:$0x1] }
  0x19   : > { %v362_v6 = vadd.s32 8, %v361_v5  ;;  %v364_v10 = vadd.s32 %v363_v7, %v361_v5  ;;  %v404_v46 = vld [vmem:[%s716_s3] sm:$0x1] (!%p490_p5) }
  0x1a   : > { %v407_v49 = vld [vmem:[%s717_s4] sm:$0x1] (!%p490_p5) }
  0x1b   : > { %v365_v9 = vadd.s32 %v363_v7, %v362_v6  ;;  %vm366_vm2 = vcmp.lt.s32.totalorder %v364_v10, 20 }
  0x1d   : > { %vm367_vm1 = vcmp.lt.s32.totalorder %v365_v9, 20 }
  0xeb   : > { %v504_v11 = vpop.f32.mrb[0].mxu0 }
  0xec   : > { %v354_v12 = vadd.f32 %v504_v11, %v486_v8  ;;  %v348_v13 = vpop.f32.mrb[1].mxu0 }
  0xed   : > { %v349_v14 = vadd.f32 %v486_v8, %v348_v13 }
  0xee   : > { %v358_v15 = vmax.f32 %v354_v12, 0.0 }
  0xef   : > { %v357_v16 = vmax.f32 %v349_v14, 0.0 }
  0xf0   : > { %v369_v17 = vsel %vm367_vm1, %v358_v15, 0.0 }
  0xf1   : > { %v382_v18 = vmul.f32 %v369_v17, %v369_v17  ;;  %v368_v19 = vsel %vm366_vm2, %v357_v16, 0.0 }
  0xf2   : > { %v371_v20 = vadd.f32 %v369_v17, %v368_v19  ;;  %v381_v21 = vmul.f32 %v368_v19, %v368_v19 }
  0xf4   : > { %v372_v22 = vrot.slane %v371_v20, 4  ;;  %v383_v23 = vadd.f32 %v382_v18, %v381_v21 }
  0xf6   : > { %v373_v24 = vadd.f32 %v372_v22, %v371_v20  ;;  %v384_v25 = vrot.slane %v383_v23, 4 }
  0xf8   : > { %v374_v26 = vrot.slane %v373_v24, 2  ;;  %v385_v27 = vadd.f32 %v384_v25, %v383_v23 }
  0xfa   : > { %v375_v28 = vadd.f32 %v374_v26, %v373_v24  ;;  %v386_v29 = vrot.slane %v385_v27, 2 }
  0xfc   : > { %v376_v30 = vrot.slane %v375_v28, 1  ;;  %v387_v31 = vadd.f32 %v386_v29, %v385_v27 }
  0xfe   : > { %v377_v33 = vadd.f32 %v376_v30, %v375_v28  ;;  %v388_v34 = vrot.slane %v387_v31, 1  ;;  %395 = sbr.rel (%p490_p5) target bundleno = 292 (0x124), region = 48 }
 0x100   : > { %v378_v36 = vadd.f32 %v377_v33, %v370_v32  ;;  %v389_v37 = vadd.f32 %v388_v34, %v387_v31 }
 0x102   : > { %379 = vst [vmem:[#allocation2] sm:$0x1] %v378_v36  ;;  %v390_v38 = vadd.f32 %v389_v37, %v380_v35 }
 0x104   : > { %391 = vst [vmem:[#allocation3] sm:$0x1] %v390_v38 }
 0x109   : > { %v396_v39 = vld [vmem:[#allocation2] sm:$0x1] }
 0x10a   : > { %v397_v41 = vmul.f32 0.05, %v396_v39 }
 0x10b   : > { %v398_v40 = vld [vmem:[#allocation3] sm:$0x1] }
 0x10c   : > { %v399_v42 = vmul.f32 0.05, %v398_v40  ;;  %v400_v43 = vmul.f32 %v397_v41, %v397_v41 }
 0x10e   : > { %v401_v44 = vsub.f32 %v399_v42, %v400_v43 }
 0x110   : > { %v402_v45 = vadd.f32 1e-05, %v401_v44 }
 0x112   : > { %528 = vrsqrt.f32 %v402_v45 }
 0x11c   : > { %v529_v47 = vpop.eup %528 }
 0x11d   : > { %v405_v48 = vmul.f32 %v529_v47, %v404_v46 }
 0x11f   : > { %406 = vst [vmem:[#allocation4] sm:$0x1] %v405_v48  ;;  %v408_v50 = vmul.f32 %v405_v48, %v397_v41 }
 0x121   : > { %v409_v51 = vsub.f32 %v407_v49, %v408_v50 }
 0x123   : > { %410 = vst [vmem:[#allocation6] sm:$0x1] %v409_v51 }
 0x124 PF: > { %p513_p6 = scmp.eq.s32.totalorder %s642_s22, 1  ;;  %s599_s13 = smov [#allocation4]  }
 0x125   : > { %s418_s14 = sshll.u32 %s599_s13, 4  ;;  %s600_s15 = smov [#allocation6]   ;;  %s419_s14 = int_to_ptr.vmem [resolvable:$true] %s418_s14 }
 0x126   : > { %s429_s16 = sshll.u32 %s600_s15, 4  ;;  %s530_s17 = scalar_lea.vmem %s419_s14, 16  ;;  %s430_s16 = int_to_ptr.vmem [resolvable:$true] %s429_s16 }
 0x127   : > { %p531_p7 = scmp.ne.s32.totalorder %s419_s14, %s530_s17  ;;  %s536_s18 = scalar_lea.vmem %s419_s14, 32 }
 0x128   : > { %p537_p10 = scmp.lt.s32.totalorder %s419_s14, %s419_s14  ;;  %p538_p11 = scmp.lt.s32.totalorder %s536_s18, %s530_s17 }
 0x129   : > { %p532_p8 = pnand %p531_p7, %p513_p6 }
 0x12a   : > { %p539_p12 = por %p538_p11, %p537_p10 }
 0x12b   : > { %p533_p9 = pneg %p532_p8 }
 0x12d   : > { %p540_p13 = pnand %p539_p12, %p533_p9 }
 0x12f   : > { %543 = shalt.err (!%p540_p13)
}
 0x130   : > { %s544_s23 = scalar_lea.hbm %s718_s5, 16 }
 0x131   : > { %p545_p0 = scmp.ne.s32.totalorder %s718_s5, %s544_s23  ;;  %p550_p3 = scmp.lt.u32.totalorder %s544_s23, %s718_s5 }
 0x133   : > { %p546_p1 = pnand %p545_p0, %p513_p6 }
 0x135   : > { %p547_p2 = pneg %p546_p1 }
 0x137   : > { %p552_p4 = pnand %p550_p3, %p547_p2 }
 0x139   : > { %555 = shalt.err (!%p552_p4)
}
 0x13a   : > { %506 = dma.vmem_to_hbm [thread:$0]  (%p513_p6), %s419_s14, 16, %s718_s5, [#allocation5]  }
 0x13b   : > { %s556_s30 = scalar_lea.vmem %s430_s16, 16  ;;  %s562_s7 = scalar_lea.vmem %s430_s16, 32 }
 0x13c   : > { %p557_p5 = scmp.ne.s32.totalorder %s430_s16, %s556_s30  ;;  %p563_p9 = scmp.lt.s32.totalorder %s430_s16, %s430_s16 }
 0x13d   : > { %p564_p10 = scmp.lt.s32.totalorder %s562_s7, %s556_s30 }
 0x13e   : > { %p558_p7 = pnand %p557_p5, %p513_p6 }
 0x13f   : > { %p565_p11 = por %p564_p10, %p563_p9 }
 0x140   : > { %p559_p8 = pneg %p558_p7 }
 0x142   : > { %p566_p12 = pnand %p565_p11, %p559_p8 }
 0x144   : > { %569 = shalt.err (!%p566_p12)
}
 0x145   : > { %s570_s10 = scalar_lea.hbm %s719_s6, 16 }
 0x146   : > { %p571_p13 = scmp.ne.s32.totalorder %s719_s6, %s570_s10  ;;  %p576_p2 = scmp.lt.u32.totalorder %s570_s10, %s719_s6 }
 0x148   : > { %p572_p0 = pnand %p571_p13, %p513_p6 }
 0x14a   : > { %p573_p1 = pneg %p572_p0 }
 0x14c   : > { %p578_p3 = pnand %p576_p2, %p573_p1 }
 0x14e   : > { %581 = shalt.err (!%p578_p3)
}
 0x14f   : > { %508 = dma.vmem_to_hbm [thread:$0]  (%p513_p6), %s430_s16, 16, %s719_s6, [#allocation7]  }
 0x150   : > { %587 = dma.done.wait (%p513_p6), [#allocation5], 16  }
 0x151   : > { %589 = vsyncadd (%p513_p6), [#allocation5], 4294967280 }
 0x152   : > { %591 = dma.done.wait (%p513_p6), [#allocation7], 16  }
 0x153   : > { %593 = vsyncadd (%p513_p6), [#allocation7], 4294967280 }
 0x154 PF: > { %s19_s21 = sadd.s32 1, %s596_s21  }
 0x155   : > { %p16_p4 = scmp.ge.s32.totalorder %s19_s21, 4  }
 0x157   :  { %18 = sbr.rel (!%p16_p4) target bundleno = 2 (0x2), region = 83 }
 0x15e   :  { %446 = vsyncpa [#allocation5], 1 }
 0x15f   :  { %448 = vsyncpa [#allocation5 + $0x1], 1 }
 0x160   :  { %449 = vsyncpa [#allocation7], 1 }

</bundles_post_ra>
